<compile_context>
chip_gen: v5e
topology: v5e:2x2
jax: 0.10.0
libtpu: 0.0.40
codegen_flags: <defaults>
</compile_context>

<pallas_src>
import functools

import jax
import jax.numpy as jnp
from jax.experimental import pallas as pl
from jax.experimental.pallas import tpu as pltpu


def _outconv_kernel(x_ref, w_ref, b_ref, o_ref):
    # x_ref: (C_in, t_hw), w_ref: (C_out, C_in), b_ref: (C_out, 1),
    # o_ref: (C_out, t_hw).  Per-column (per-pixel) channel matmul + bias.
    #
    # With tiny K (C_in <= 8) the MXU pass is mostly padding; an unrolled VPU FMA
    # is a possible alternative, but this kernel is HBM-bandwidth-bound and the
    # dot is hidden under the block DMAs, so we keep the simple, known-good
    # lowering.
    # TODO(synk): swap to an unrolled VPU FMA for C_in<=8 if a bundle dump shows
    # the vmatmul push/pop on the per-step critical path at small grids.
    acc = jnp.dot(w_ref[...], x_ref[...], preferred_element_type=jnp.float32)
    o_ref[...] = (acc + b_ref[...]).astype(o_ref.dtype)


def _pad8(c):
    return ((c + 7) // 8) * 8


def _round_down_128(v):
    return max(128, (v // 128) * 128)


def _pick_hw_tile(hw, n_batch, c_in, c_out, itemsize,
                  max_hw_tile, vmem_data_budget, min_grid_steps):
    """Largest lane-dense HW tile that (a) fits the VMEM data budget when
    double-buffered and (b) leaves >= min_grid_steps grid steps so both v7x
    TensorCores get work and the pipeline can overlap DMA with compute."""
    if hw <= 128:
        return hw  # full-extent block — always legal, nothing to tile.

    # Per-lane VMEM cost: double-buffered input (pad8(C_in), t) + output
    # (pad8(C_out), t) blocks.
    per_lane_bytes = 2 * (_pad8(c_in) + _pad8(c_out)) * itemsize
    t = min(max_hw_tile, max(128, vmem_data_budget // per_lane_bytes))
    t = _round_down_128(t)
    if t >= hw:
        t = hw  # full-extent block is legal regardless of 128-alignment.

    # Megacore / pipeline: ensure enough total grid steps (>= min_grid_steps)
    # by shrinking the tile (kept a multiple of 128, never below 128).
    n_hw_needed = -(-min_grid_steps // max(1, n_batch))  # ceil div
    if n_hw_needed > 1:
        t_cap = _round_down_128(-(-hw // n_hw_needed))
        t = min(t, t_cap)
    return t


@functools.partial(jax.jit, static_argnames=("max_hw_tile",))
def outconv_forward(x_nchw, weight, bias, max_hw_tile=16384):
    """1x1 Conv2d forward.

    x_nchw : (N, C_in, H, W)
    weight : (C_out, C_in)   (kernel_size=1 -> squeezed spatial dims)
    bias   : (C_out,)
    returns: (N, C_out, H, W) in x's dtype
    """
    N, C_in, H, W = x_nchw.shape
    C_out = weight.shape[0]
    HW = H * W
    itemsize = jnp.dtype(x_nchw.dtype).itemsize

    # Free reshape (no data movement): pixels land on the lane (last) axis.
    x_flat = x_nchw.reshape(N, C_in, HW)
    # Bias kept in f32 — accumulate/bias-add in f32 even for bf16 I/O.
    b2d = bias.astype(jnp.float32).reshape(C_out, 1)

    # ---- tile / VMEM sizing -------------------------------------------------
    # 12 MiB data budget: under v5e's 16 MiB scoped default and leaves ample
    # slack in v7x's 64 MiB physical VMEM after double-buffering.
    VMEM_DATA_BUDGET = 12 * 1024 * 1024
    t_hw = _pick_hw_tile(HW, N, C_in, C_out, itemsize,
                         max_hw_tile=max_hw_tile,
                         vmem_data_budget=VMEM_DATA_BUDGET,
                         min_grid_steps=4)
    grid = (N, pl.cdiv(HW, t_hw))

    # Explicit scoped-VMEM limit: estimated footprint + headroom, clamped to
    # [32 MiB, 48 MiB] — above v5e's 16 MiB / v6e-v7x's 32 MiB defaults, below
    # v7x's 64 MiB physical.
    data_bytes = (2 * (_pad8(C_in) + _pad8(C_out)) * t_hw        # x + y blocks (2 bufs)
                  + _pad8(C_out) * max(128, C_in)                # weight block
                  + _pad8(C_out) * 128) * itemsize               # bias block
    vmem_limit = int(min(48 << 20, max(32 << 20, data_bytes + (8 << 20))))

    # Grid-resident weight/bias (constant index_map). Single-buffer them once
    # the dead second copy would actually cost VMEM; keep the default for tiny
    # weights where it is irrelevant.
    wb_kwargs = {}
    if C_out * C_in * itemsize >= (64 << 10):
        wb_kwargs = dict(pipeline_mode=pl.Buffered(1))
    w_spec = pl.BlockSpec((C_out, C_in), lambda n, j: (0, 0), **wb_kwargs)
    b_spec = pl.BlockSpec((C_out, 1), lambda n, j: (0, 0), **wb_kwargs)

    cost = pl.CostEstimate(
        flops=2 * N * HW * C_in * C_out,
        transcendentals=0,
        bytes_accessed=(N * HW * (C_in + C_out) + C_in * C_out + C_out) * itemsize,
    )

    out_flat = pl.pallas_call(
        _outconv_kernel,
        out_shape=jax.ShapeDtypeStruct((N, C_out, HW), x_nchw.dtype),
        grid_spec=pltpu.PrefetchScalarGridSpec(
            num_scalar_prefetch=0,
            grid=grid,
            in_specs=[
                # Input pixels: lane-dense (C_in, t_hw) block per (n, hw-tile).
                pl.BlockSpec((None, C_in, t_hw), lambda n, j: (n, 0, j)),
                w_spec,
                b_spec,
            ],
            out_specs=pl.BlockSpec((None, C_out, t_hw), lambda n, j: (n, 0, j)),
        ),
        compiler_params=pltpu.CompilerParams(
            dimension_semantics=("parallel", "parallel"),
            vmem_limit_bytes=vmem_limit,
        ),
        cost_estimate=cost,
    )(x_flat, weight, b2d)

    # Free reshape back to NCHW.
    return out_flat.reshape(N, C_out, H, W)


def init_outconv_params(key, in_channels, out_channels):
    """Deterministic init matching nn.Conv2d(in, out, kernel_size=1) shapes.

    PyTorch default: uniform(-k, k), k = 1/sqrt(fan_in).
    """
    kw, kb = jax.random.split(key)
    fan_in = in_channels * 1 * 1
    bound = 1.0 / jnp.sqrt(fan_in)
    weight = jax.random.uniform(
        kw, (out_channels, in_channels), jnp.float32, -bound, bound)
    bias = jax.random.uniform(
        kb, (out_channels,), jnp.float32, -bound, bound)
    return weight, bias


if __name__ == "__main__":
    key = jax.random.PRNGKey(0)
    k_x, k_p = jax.random.split(key)

    N, C_in, H, W = 2, 4, 16, 16
    C_out = 3

    x = jax.random.normal(k_x, (N, C_in, H, W), jnp.float32)
    weight, bias = init_outconv_params(k_p, C_in, C_out)

    y = jax.block_until_ready(outconv_forward(x, weight, bias))

    # Reference check against plain-JAX 1x1 conv semantics.
    y_ref = jnp.einsum("nchw,oc->nohw", x, weight) + bias[None, :, None, None]
    assert y.shape == (N, C_out, H, W)
    assert jnp.allclose(y, y_ref, atol=1e-5, rtol=1e-5)

    print("KERNEL_OK")
</pallas_src>

<mosaic_0001>
module attributes {stable_mosaic.version = 11 : i64} {
  func.func @_outconv_kernel(%arg0: i32, %arg1: i32, %arg2: memref<1x4x128xf32, #tpu.memory_space<vmem>>, %arg3: memref<3x4xf32, #tpu.memory_space<vmem>>, %arg4: memref<3x1xf32, #tpu.memory_space<vmem>>, %arg5: memref<1x3x128xf32, #tpu.memory_space<vmem>>) attributes {dimension_semantics = [#tpu.dimension_semantics<parallel>, #tpu.dimension_semantics<parallel>], iteration_bounds = array<i64: 2, 2>, scalar_prefetch = 0 : i64, scratch_operands = 0 : i64, tpu.core_type = #tpu.core_type<tc>, window_params = [{transform_indices = @transform_0, window_bounds = array<i64: 1, 4, 128>}, {pipeline_mode = #tpu.pipeline_mode<synchronous>, transform_indices = @transform_1, window_bounds = array<i64: 3, 4>}, {pipeline_mode = #tpu.pipeline_mode<synchronous>, transform_indices = @transform_2, window_bounds = array<i64: 3, 1>}, {transform_indices = @transform_3, window_bounds = array<i64: 1, 3, 128>}]} {
    %c0 = arith.constant 0 : index
    %c0_0 = arith.constant 0 : index
    %0 = vector.load %arg3[%c0, %c0_0] : memref<3x4xf32, #tpu.memory_space<vmem>>, vector<3x4xf32>
    %c0_1 = arith.constant 0 : index
    %c0_2 = arith.constant 0 : index
    %c0_3 = arith.constant 0 : index
    %1 = vector.load %arg2[%c0_1, %c0_2, %c0_3] : memref<1x4x128xf32, #tpu.memory_space<vmem>>, vector<1x4x128xf32>
    %2 = vector.shape_cast %1 : vector<1x4x128xf32> to vector<4x128xf32>
    %cst = arith.constant dense<0.000000e+00> : vector<3x128xf32>
    %3 = tpu.matmul %0, %2, %cst {dimension_numbers = #tpu.dot_dimension_numbers<[1], [0], [0], [1], [0, 0, 1, 1], [], []>} : vector<3x4xf32>, vector<4x128xf32>, vector<3x128xf32> -> vector<3x128xf32>
    %c0_4 = arith.constant 0 : index
    %c0_5 = arith.constant 0 : index
    %4 = vector.load %arg4[%c0_4, %c0_5] : memref<3x1xf32, #tpu.memory_space<vmem>>, vector<3x1xf32>
    %5 = vector.broadcast %4 : vector<3x1xf32> to vector<3x128xf32>
    %6 = arith.addf %3, %5 : vector<3x128xf32>
    %c0_6 = arith.constant 0 : index
    %c0_7 = arith.constant 0 : index
    %c0_8 = arith.constant 0 : index
    %7 = vector.load %arg5[%c0_6, %c0_7, %c0_8] : memref<1x3x128xf32, #tpu.memory_space<vmem>>, vector<1x3x128xf32>
    %8 = vector.shape_cast %7 : vector<1x3x128xf32> to vector<3x128xf32>
    %9 = vector.shape_cast %6 : vector<3x128xf32> to vector<1x3x128xf32>
    tpu.vector_store %arg5[%c0_6, %c0_7, %c0_8], %9 {strides = array<i32>} : memref<1x3x128xf32, #tpu.memory_space<vmem>>, vector<1x3x128xf32>,
    return
  }
  func.func @transform_0(%arg0: i32, %arg1: i32) -> (i32, i32, i32) {
    %c0_i32 = arith.constant 0 : i32
    %c0_i32_0 = arith.constant 0 : i32
    return %arg0, %c0_i32, %arg1 : i32, i32, i32
  }
  func.func @transform_1(%arg0: i32, %arg1: i32) -> (i32, i32) {
    %c0_i32 = arith.constant 0 : i32
    %c0_i32_0 = arith.constant 0 : i32
    %c0_i32_1 = arith.constant 0 : i32
    return %c0_i32, %c0_i32_0 : i32, i32
  }
  func.func @transform_2(%arg0: i32, %arg1: i32) -> (i32, i32) {
    %c0_i32 = arith.constant 0 : i32
    %c0_i32_0 = arith.constant 0 : i32
    %c0_i32_1 = arith.constant 0 : i32
    return %c0_i32, %c0_i32_0 : i32, i32
  }
  func.func @transform_3(%arg0: i32, %arg1: i32) -> (i32, i32, i32) {
    %c0_i32 = arith.constant 0 : i32
    %c0_i32_0 = arith.constant 0 : i32
    return %arg0, %c0_i32, %arg1 : i32, i32, i32
  }
}

</mosaic_0001>

<bundles_post_ra>
// kernel: outconv_forward.1
= control target key start
LH: loop header
LB: loop body
LE: loop exit
PB: predicated region body
PF: predicated region fallthrough
CT: control target
= control target key end

     0   :  { %s441_s12 = smov 0   ;;  %s443_s13 = smov 0   ;;  %s498_s0 = inlined_call_operand.vmem [shape: f32[2,4,256], index: 0, kind: input, shape index: {}]   ;;  %s499_s1 = inlined_call_operand.vmem [shape: f32[3,4], index: 1, kind: input, shape index: {}]   ;;  %s500_s2 = inlined_call_operand.vmem [shape: f32[3,1], index: 2, kind: input, shape index: {}]   ;;  %s501_s3 = inlined_call_operand.vmem [shape: f32[2,3,256], index: 3, kind: output, shape index: {}]  }
   0x1   :  { %s445_s14 = smov 0   ;;  %s447_s15 = smov 0  }
   0x2   :  { %s449_s16 = smov 0  }
   0x3 LB: > { %s22_s17 = sadd.s32 1, %s410_s14  ;;  %s25_s18 = sadd.s32 1, %s414_s15  ;;  %s418_s16 = sphi %s449_s16, %s13_s16   ;;  %s414_s15 = sphi %s447_s15, %s505_s15   ;;  %s410_s14 = sphi %s445_s14, %s504_s14   ;;  %s406_s13 = sphi %s443_s13, %s503_s13   ;;  %s402_s12 = sphi %s441_s12, %s502_s12  }
   0x4   : > { %p23_p0 = scmp.ge.s32.totalorder %s22_s17, 2  ;;  %p329_p1 = scmp.ge.s32.totalorder %s418_s16, 1 }
   0x5   : > { %p156_p2 = scmp.lt.s32.totalorder %s418_s16, 5 }
   0x6   : > { %s507_s17 = smov (%p23_p0, %s22_s17), 0  ;;  %s509_s18 = smov (!%p23_p0, %s25_s18), %s414_s15 }
   0x7   : > { %p157_p3 = pnand %p329_p1, %p156_p2  ;;  %p27_p4 = scmp.ge.s32.totalorder %s509_s18, 2 }
   0x8   : > { %p186_p5 = scmp.lt.s32.totalorder (!%p157_p3), %s406_s13, 1  ;;  %p188_p6 = scmp.lt.s32.totalorder (!%p157_p3), %s402_s12, 1 }
   0x9   : > { %s511_s18 = smov (%p27_p4, %s509_s18), 0  ;;  %160 = sbr.rel (%p157_p3) target bundleno = 150 (0x96), region = 32 }
   0xe   : > { %v204_v0 = vld [vmem:[%s500_s2] sm:$0x7]  ;;  %s513_s13 = smov (!%p186_p5, %s406_s13), 1  ;;  %v420_v1 = vmov 0   ;;  %s515_s12 = smov (!%p188_p6, %s402_s12), 1  ;;  %vm214_vm0 = vcmask 1043456  }
   0xf   : > { %379 = vset.pattern.permute.xlu0 %v420_v1  ;;  %s330_s21 = sshll.u32 %s513_s13, 1  ;;  %v202_v2 = vld [vmem:[%s499_s1] sm:$0x7]  ;;  %vm210_vm1 = vcmask 31744  }
  0x10   : > { %207 = vperm.xlu0 %379, %v204_v0   ;;  %s191_s22 = sadd.s32 %s330_s21, %s515_s12 }
  0x11   : > { %s331_s23 = sshll.u32 %s191_s22, 2 }
  0x12   : > { %s193_s26 = scalar_lea.vmem %s498_s0, %s331_s23  ;;  %s201_s4 = scalar_lea.vmem %s501_s3, %s331_s23 }
  0x13   : > { %v203_v3 = vld [vmem:[%s193_s26] sm:$0xf] }
  0x14   : > { %334 = vmatpush.msk.msra.mxu0 %vm214_vm0, %v203_v3 }
  0x15   : > { %335 = vmatmul.msk.f32.vlgmr.msra.gmra.mxu0 %vm210_vm1, %v202_v2 }
  0x82   : > { %v208_v4 = vpop.permute.xlu0 %207 }
  0x92   : > { %v235_v5 = vpop.f32.mrf.mxu0 }
  0x93   : > { %v236_v6 = vadd.f32 %v235_v5, %v208_v4 }
  0x95   : > { %238 = vst [vmem:[%s201_s4] sm:$0x7] %v236_v6 }
  0x96 PF: > { %s13_s16 = sadd.s32 1, %s418_s16   ;;  %s502_s12 = smov %s410_s14 }
  0x97   : > { %p10_p7 = scmp.ge.s32.totalorder %s13_s16, 6   ;;  %s503_s13 = smov %s414_s15 }
  0x98   : > { %s504_s14 = smov %s507_s17  ;;  %s505_s15 = smov %s511_s18 }
  0x99   :  { %12 = sbr.rel (!%p10_p7) target bundleno = 3 (0x3), region = 62 }

</bundles_post_ra>
